<compile_context>
chip_gen: v6e
topology: v6e:2x2x1
jax: 0.10.0
libtpu: 0.0.40
codegen_flags: <defaults>
</compile_context>

<pallas_src>
import functools

import jax
import jax.numpy as jnp
from jax.experimental import pallas as pl
from jax.experimental.pallas import tpu as pltpu

LANE = 128  # TPU vreg lane width


def _decoder_kernel(ids_ref,      # SMEM [B]                int32 token ids
                    emb_ref,      # VMEM [O, 1, LANE]        embedding rows (E lanes used)
                    h_ref,        # VMEM [B, LANE]           padded hidden (H lanes used)
                    w_g_ref,      # VMEM [2*LANE, 4*LANE]    fused gate weights
                    b_g_ref,      # VMEM [1, 4*LANE]         fused gate biases
                    w_o_ref,      # VMEM [LANE, LANE]        W_out^T, padded
                    b_o_ref,      # VMEM [1, LANE]           b_out, padded
                    logits_ref,   # VMEM [B, LANE]           out (O lanes used)
                    h_new_ref):   # VMEM [B, LANE]           out (H lanes used)
    B = h_ref.shape[0]

    # --- embedding gather, in-kernel (B is small & static) -------------------
    rows = [emb_ref[ids_ref[b]] for b in range(B)]        # each [1, LANE]
    x = jnp.concatenate(rows, axis=0)                     # [B, LANE]
    h = h_ref[...]                                        # [B, LANE]

    # --- single fused MXU push for all GRU gate matmuls ----------------------
    # [embedded | hidden]: both slabs are exactly one vreg wide -> concat is
    # vreg-aligned (no cross-lane shuffles).
    xh = jnp.concatenate([x, h], axis=1)                  # [B, 2*LANE]
    g = jnp.dot(xh, w_g_ref[...],
                preferred_element_type=jnp.float32) + b_g_ref[...]   # [B, 4*LANE]

    # Gate slabs at 128-lane boundaries (whole-vreg slices).
    r = jax.nn.sigmoid(g[:, 0 * LANE:1 * LANE])
    z = jax.nn.sigmoid(g[:, 1 * LANE:2 * LANE])
    n = jnp.tanh(g[:, 2 * LANE:3 * LANE] + r * g[:, 3 * LANE:4 * LANE])
    h_new = (1.0 - z) * n + z * h                         # padded lanes stay 0
    h_new_ref[...] = h_new.astype(h_new_ref.dtype)        # unmasked 128-lane store

    # --- output projection (pre-transposed, lane dense) ----------------------
    logits = jnp.dot(h_new, w_o_ref[...],
                     preferred_element_type=jnp.float32) + b_o_ref[...]
    logits_ref[...] = logits.astype(logits_ref.dtype)     # unmasked 128-lane store


def pack_params(params):
    """One-time packing: pre-transpose, fuse and 128-lane-pad all weights."""
    emb = params["embedding"]                   # [O, E]
    w_ih, b_ih = params["w_ih"], params["b_ih"]  # [3H, E], [3H]
    w_hh, b_hh = params["w_hh"], params["b_hh"]  # [3H, H], [3H]
    w_out, b_out = params["w_out"], params["b_out"]  # [O, H], [O]

    O, E = emb.shape
    H = w_hh.shape[1]
    assert E <= LANE and H <= LANE and O <= LANE, "single-slab packing assumes <=128"

    # Embedding rows, lane-padded, leading-dim dynamically indexable.
    emb_pad = jnp.zeros((O, 1, LANE), jnp.float32).at[:, 0, :E].set(emb)

    # PyTorch GRUCell gate order: r, z, n.
    w_ir, w_iz, w_in = w_ih[:H], w_ih[H:2 * H], w_ih[2 * H:]
    w_hr, w_hz, w_hn = w_hh[:H], w_hh[H:2 * H], w_hh[2 * H:]
    b_ir, b_iz, b_in = b_ih[:H], b_ih[H:2 * H], b_ih[2 * H:]
    b_hr, b_hz, b_hn = b_hh[:H], b_hh[H:2 * H], b_hh[2 * H:]

    # Fused gate weight: rows 0:E  -> embedded-input side,
    #                    rows LANE:LANE+H -> hidden side.
    # Column slabs (each 128 lanes): [ r | z | n_input | n_hidden ].
    w_g = jnp.zeros((2 * LANE, 4 * LANE), jnp.float32)
    w_g = w_g.at[:E, 0 * LANE:0 * LANE + H].set(w_ir.T)
    w_g = w_g.at[:E, 1 * LANE:1 * LANE + H].set(w_iz.T)
    w_g = w_g.at[:E, 2 * LANE:2 * LANE + H].set(w_in.T)
    w_g = w_g.at[LANE:LANE + H, 0 * LANE:0 * LANE + H].set(w_hr.T)
    w_g = w_g.at[LANE:LANE + H, 1 * LANE:1 * LANE + H].set(w_hz.T)
    w_g = w_g.at[LANE:LANE + H, 3 * LANE:3 * LANE + H].set(w_hn.T)

    b_g = jnp.zeros((1, 4 * LANE), jnp.float32)
    b_g = b_g.at[0, 0 * LANE:0 * LANE + H].set(b_ir + b_hr)  # r: biases pre-summed
    b_g = b_g.at[0, 1 * LANE:1 * LANE + H].set(b_iz + b_hz)  # z: biases pre-summed
    b_g = b_g.at[0, 2 * LANE:2 * LANE + H].set(b_in)         # n (input side)
    b_g = b_g.at[0, 3 * LANE:3 * LANE + H].set(b_hn)         # n (hidden side)

    # Output projection, pre-transposed and lane padded.
    w_o = jnp.zeros((LANE, LANE), jnp.float32).at[:H, :O].set(w_out.T)
    b_o = jnp.zeros((1, LANE), jnp.float32).at[0, :O].set(b_out)

    return {"emb": emb_pad, "w_g": w_g, "b_g": b_g, "w_o": w_o, "b_o": b_o}


@functools.partial(jax.jit, static_argnames=("H", "O"))
def decoder_forward(last_output, hidden, packed, *, H, O):
    """Pallas implementation of Decoder.forward.

    last_output: int32 [B] token ids
    hidden:      f32   [B, H]
    returns (logits [B, O], output_hidden [B, H])
    """
    B = last_output.shape[0]

    # Lane-dense padded hidden state (keeps in-kernel stores unmasked).
    h_pad = jnp.zeros((B, LANE), jnp.float32).at[:, :H].set(hidden)

    vmem = pl.BlockSpec(memory_space=pltpu.MemorySpace.VMEM)
    smem = pl.BlockSpec(memory_space=pltpu.MemorySpace.SMEM)

    logits_pad, h_new_pad = pl.pallas_call(
        _decoder_kernel,
        out_shape=(
            jax.ShapeDtypeStruct((B, LANE), jnp.float32),
            jax.ShapeDtypeStruct((B, LANE), jnp.float32),
        ),
        in_specs=[smem, vmem, vmem, vmem, vmem, vmem, vmem],
        out_specs=(vmem, vmem),
        # hidden (input 2) aliases onto h_new (output 1): no extra HBM buffer.
        input_output_aliases={2: 1},
    )(
        last_output.astype(jnp.int32),
        packed["emb"], h_pad,
        packed["w_g"], packed["b_g"],
        packed["w_o"], packed["b_o"],
    )
    return logits_pad[:, :O], h_new_pad[:, :H]


def _reference_forward(last_output, hidden, params):
    """Pure-JAX reference mirroring torch.nn.GRUCell + Linear."""
    emb = jnp.take(params["embedding"], last_output, axis=0)
    H = hidden.shape[1]
    gi = emb @ params["w_ih"].T + params["b_ih"]
    gh = hidden @ params["w_hh"].T + params["b_hh"]
    i_r, i_z, i_n = gi[:, :H], gi[:, H:2 * H], gi[:, 2 * H:]
    h_r, h_z, h_n = gh[:, :H], gh[:, H:2 * H], gh[:, 2 * H:]
    r = jax.nn.sigmoid(i_r + h_r)
    z = jax.nn.sigmoid(i_z + h_z)
    n = jnp.tanh(i_n + r * h_n)
    h_new = (1.0 - z) * n + z * hidden
    logits = h_new @ params["w_out"].T + params["b_out"]
    return logits, h_new


def init_params(key, output_size, embedding_size, hidden_size):
    ks = jax.random.split(key, 7)
    scale = 0.1
    return {
        "embedding": scale * jax.random.normal(ks[0], (output_size, embedding_size), jnp.float32),
        "w_ih": scale * jax.random.normal(ks[1], (3 * hidden_size, embedding_size), jnp.float32),
        "b_ih": scale * jax.random.normal(ks[2], (3 * hidden_size,), jnp.float32),
        "w_hh": scale * jax.random.normal(ks[3], (3 * hidden_size, hidden_size), jnp.float32),
        "b_hh": scale * jax.random.normal(ks[4], (3 * hidden_size,), jnp.float32),
        "w_out": scale * jax.random.normal(ks[5], (output_size, hidden_size), jnp.float32),
        "b_out": scale * jax.random.normal(ks[6], (output_size,), jnp.float32),
    }


if __name__ == "__main__":
    # Config: output_size (vocab) = 16, ptb_tag_embedding_size = 32,
    # decoder_hidden_size = 32, rnn_class = 'gru', batch = 2.
    B, O, E, H = 2, 16, 32, 32

    key = jax.random.PRNGKey(0)
    k_param, k_tok, k_hid = jax.random.split(key, 3)

    params = init_params(k_param, O, E, H)
    last_output = jax.random.randint(k_tok, (B,), 0, O, dtype=jnp.int32)
    hidden = 0.1 * jax.random.normal(k_hid, (B, H), jnp.float32)

    packed = pack_params(params)  # one-time weight packing (not in the hot path)

    logits, h_new = decoder_forward(last_output, hidden, packed, H=H, O=O)
    jax.block_until_ready((logits, h_new))

    ref_logits, ref_h = _reference_forward(last_output, hidden, params)
    # Slightly relaxed rtol: the fused single-matmul accumulation reorders sums
    # vs. the two-matmul reference (both f32-on-MXU).
    assert jnp.allclose(logits, ref_logits, atol=1e-5, rtol=1e-4), \
        f"logits max abs err {float(jnp.max(jnp.abs(logits - ref_logits)))}"
    assert jnp.allclose(h_new, ref_h, atol=1e-5, rtol=1e-4), \
        f"hidden max abs err {float(jnp.max(jnp.abs(h_new - ref_h)))}"

    print("KERNEL_OK")
</pallas_src>

<mosaic_0001>
module attributes {stable_mosaic.version = 11 : i64} {
  func.func @_decoder_kernel(%arg0: memref<2xi32, #tpu.memory_space<smem>>, %arg1: memref<16x1x128xf32, #tpu.memory_space<vmem>>, %arg2: memref<2x128xf32, #tpu.memory_space<vmem>>, %arg3: memref<256x512xf32, #tpu.memory_space<vmem>>, %arg4: memref<1x512xf32, #tpu.memory_space<vmem>>, %arg5: memref<128x128xf32, #tpu.memory_space<vmem>>, %arg6: memref<1x128xf32, #tpu.memory_space<vmem>>, %arg7: memref<2x128xf32, #tpu.memory_space<vmem>>, %arg8: memref<2x128xf32, #tpu.memory_space<vmem>>) attributes {dimension_semantics = [], scalar_prefetch = 0 : i64, scratch_operands = 0 : i64, tpu.core_type = #tpu.core_type<tc>} {
    %c0 = arith.constant 0 : index
    %0 = memref.load %arg0[%c0] : memref<2xi32, #tpu.memory_space<smem>>
    %1 = arith.index_cast %0 : i32 to index
    %c0_0 = arith.constant 0 : index
    %c0_1 = arith.constant 0 : index
    %2 = vector.load %arg1[%1, %c0_0, %c0_1] : memref<16x1x128xf32, #tpu.memory_space<vmem>>, vector<1x1x128xf32>
    %3 = vector.shape_cast %2 : vector<1x1x128xf32> to vector<1x128xf32>
    %c1 = arith.constant 1 : index
    %4 = memref.load %arg0[%c1] : memref<2xi32, #tpu.memory_space<smem>>
    %5 = arith.index_cast %4 : i32 to index
    %c0_2 = arith.constant 0 : index
    %c0_3 = arith.constant 0 : index
    %6 = vector.load %arg1[%5, %c0_2, %c0_3] : memref<16x1x128xf32, #tpu.memory_space<vmem>>, vector<1x1x128xf32>
    %7 = vector.shape_cast %6 : vector<1x1x128xf32> to vector<1x128xf32>
    %8 = tpu.concatenate %3, %7 in 0 : vector<1x128xf32>, vector<1x128xf32> -> vector<2x128xf32>
    %c0_4 = arith.constant 0 : index
    %c0_5 = arith.constant 0 : index
    %9 = vector.load %arg2[%c0_4, %c0_5] : memref<2x128xf32, #tpu.memory_space<vmem>>, vector<2x128xf32>
    %10 = tpu.concatenate %8, %9 in 1 : vector<2x128xf32>, vector<2x128xf32> -> vector<2x256xf32>
    %c0_6 = arith.constant 0 : index
    %c0_7 = arith.constant 0 : index
    %11 = vector.load %arg3[%c0_6, %c0_7] : memref<256x512xf32, #tpu.memory_space<vmem>>, vector<256x512xf32>
    %cst = arith.constant dense<0.000000e+00> : vector<2x512xf32>
    %12 = tpu.matmul %10, %11, %cst {dimension_numbers = #tpu.dot_dimension_numbers<[1], [0], [0], [1], [0, 0, 1, 1], [], []>} : vector<2x256xf32>, vector<256x512xf32>, vector<2x512xf32> -> vector<2x512xf32>
    %c0_8 = arith.constant 0 : index
    %c0_9 = arith.constant 0 : index
    %13 = vector.load %arg4[%c0_8, %c0_9] : memref<1x512xf32, #tpu.memory_space<vmem>>, vector<1x512xf32>
    %14 = vector.broadcast %13 : vector<1x512xf32> to vector<2x512xf32>
    %15 = arith.addf %12, %14 : vector<2x512xf32>
    %16 = vector.extract_strided_slice %15 {offsets = [0, 0], sizes = [2, 128], strides = [1, 1]} : vector<2x512xf32> to vector<2x128xf32>
    %17 = arith.negf %16 : vector<2x128xf32>
    %18 = math.exp %17 : vector<2x128xf32>
    %cst_10 = arith.constant 1.000000e+00 : f32
    %19 = vector.broadcast %cst_10 : f32 to vector<2x128xf32>
    %20 = arith.addf %19, %18 : vector<2x128xf32>
    %21 = arith.divf %19, %20 : vector<2x128xf32>
    %22 = vector.extract_strided_slice %15 {offsets = [0, 128], sizes = [2, 128], strides = [1, 1]} : vector<2x512xf32> to vector<2x128xf32>
    %23 = arith.negf %22 : vector<2x128xf32>
    %24 = math.exp %23 : vector<2x128xf32>
    %cst_11 = arith.constant 1.000000e+00 : f32
    %25 = vector.broadcast %cst_11 : f32 to vector<2x128xf32>
    %26 = arith.addf %25, %24 : vector<2x128xf32>
    %27 = arith.divf %25, %26 : vector<2x128xf32>
    %28 = vector.extract_strided_slice %15 {offsets = [0, 256], sizes = [2, 128], strides = [1, 1]} : vector<2x512xf32> to vector<2x128xf32>
    %29 = vector.extract_strided_slice %15 {offsets = [0, 384], sizes = [2, 128], strides = [1, 1]} : vector<2x512xf32> to vector<2x128xf32>
    %30 = arith.mulf %21, %29 : vector<2x128xf32>
    %31 = arith.addf %28, %30 : vector<2x128xf32>
    %32 = math.tanh %31 : vector<2x128xf32>
    %cst_12 = arith.constant 1.000000e+00 : f32
    %33 = vector.broadcast %cst_12 : f32 to vector<2x128xf32>
    %34 = arith.subf %33, %27 : vector<2x128xf32>
    %35 = arith.mulf %34, %32 : vector<2x128xf32>
    %36 = arith.mulf %27, %9 : vector<2x128xf32>
    %37 = arith.addf %35, %36 : vector<2x128xf32>
    %c0_13 = arith.constant 0 : index
    %c0_14 = arith.constant 0 : index
    %38 = vector.load %arg8[%c0_13, %c0_14] : memref<2x128xf32, #tpu.memory_space<vmem>>, vector<2x128xf32>
    tpu.vector_store %arg8[%c0_13, %c0_14], %37 {strides = array<i32>} : memref<2x128xf32, #tpu.memory_space<vmem>>, vector<2x128xf32>,
    %c0_15 = arith.constant 0 : index
    %c0_16 = arith.constant 0 : index
    %39 = vector.load %arg5[%c0_15, %c0_16] : memref<128x128xf32, #tpu.memory_space<vmem>>, vector<128x128xf32>
    %cst_17 = arith.constant dense<0.000000e+00> : vector<2x128xf32>
    %40 = tpu.matmul %37, %39, %cst_17 {dimension_numbers = #tpu.dot_dimension_numbers<[1], [0], [0], [1], [0, 0, 1, 1], [], []>} : vector<2x128xf32>, vector<128x128xf32>, vector<2x128xf32> -> vector<2x128xf32>
    %c0_18 = arith.constant 0 : index
    %c0_19 = arith.constant 0 : index
    %41 = vector.load %arg6[%c0_18, %c0_19] : memref<1x128xf32, #tpu.memory_space<vmem>>, vector<1x128xf32>
    %42 = vector.broadcast %41 : vector<1x128xf32> to vector<2x128xf32>
    %43 = arith.addf %40, %42 : vector<2x128xf32>
    %c0_20 = arith.constant 0 : index
    %c0_21 = arith.constant 0 : index
    %44 = vector.load %arg7[%c0_20, %c0_21] : memref<2x128xf32, #tpu.memory_space<vmem>>, vector<2x128xf32>
    tpu.vector_store %arg7[%c0_20, %c0_21], %43 {strides = array<i32>} : memref<2x128xf32, #tpu.memory_space<vmem>>, vector<2x128xf32>,
    return
  }
}

</mosaic_0001>

<bundles_post_ra>
// kernel: decoder_forward.1
= control target key start
LH: loop header
LB: loop body
LE: loop exit
PB: predicated region body
PF: predicated region fallthrough
CT: control target
= control target key end

     0   :  { %14 = vsyncpa [#allocation5], 0  ;;  %s800_s0 = inlined_call_operand.vmem [shape: s32[2], index: 0, kind: input, shape index: {}]   ;;  %s801_s1 = inlined_call_operand.vmem [shape: f32[16,1,128], index: 1, kind: input, shape index: {}]   ;;  %s802_s2 = inlined_call_operand.vmem [shape: f32[2,128], index: 2, kind: input, shape index: {}, may-alias: {2,8}]   ;;  %s803_s3 = inlined_call_operand.hbm [shape: f32[256,512], index: 3, kind: input, shape index: {}]   ;;  %s804_s4 = inlined_call_operand.hbm [shape: f32[1,512], index: 4, kind: input, shape index: {}]   ;;  %s805_s5 = inlined_call_operand.hbm [shape: f32[128,128], index: 5, kind: input, shape index: {}]   ;;  %s806_s6 = inlined_call_operand.vmem [shape: f32[1,128], index: 6, kind: input, shape index: {}]   ;;  %s807_s7 = inlined_call_operand.hbm [shape: f32[2,128], index: 7, kind: output, shape index: {0}]   ;;  %s808_s8 = inlined_call_operand.vmem [shape: f32[2,128], index: 8, kind: output, shape index: {1}, may-alias: {2,8}]  }
   0x1   :  { %15 = vsyncpa [#allocation3], 0 }
   0x2   :  { %16 = vsyncpa [#allocation8], 0 }
   0x3   :  { %17 = vsyncpa [#allocation4], 0  ;;  %s24_s29 = sshll.u32 %s800_s0, 4  ;;  %s703_s30 = smov [#allocation7]   ;;  %s25_s29 = int_to_ptr.vmem [resolvable:$true] %s24_s29 }
   0x4   :  { %s50_s9 = sshll.u32 %s703_s30, 4  ;;  %s51_s9 = int_to_ptr.vmem [resolvable:$true] %s50_s9 }
   0x5   :  { %s611_s10 = scalar_lea.vmem %s51_s9, 64  ;;  %p616_p1 = scmp.lt.s32.totalorder %s51_s9, %s51_s9 }
   0x6   :  { %p612_p0 = scmp.ne.s32.totalorder %s51_s9, %s611_s10  ;;  %p617_p2 = scmp.lt.s32.totalorder %s611_s10, %s611_s10 }
   0x8   :  { %p618_p3 = por %p617_p2, %p616_p1 }
   0xa   :  { %p619_p4 = pnand %p618_p3, %p612_p0 }
   0xc   :  { %622 = shalt.err (!%p619_p4)
}
   0xd   :  { %53 = dma.hbm_to_vmem [thread:$0]  %s804_s4, 64, %s51_s9, [#allocation8]  }
   0xe   :  { %s623_s13 = scalar_lea.vmem %s25_s29, 16  ;;  %p628_p6 = scmp.lt.s32.totalorder %s25_s29, %s25_s29 }
   0xf   :  { %p624_p5 = scmp.ne.s32.totalorder %s25_s29, %s623_s13  ;;  %p629_p7 = scmp.lt.s32.totalorder %s623_s13, %s623_s13 }
  0x11   :  { %p630_p8 = por %p629_p7, %p628_p6 }
  0x13   :  { %p631_p9 = pnand %p630_p8, %p624_p5 }
  0x15   :  { %634 = shalt.err (!%p631_p9)
}
  0x16   :  { %s704_s0 = smov [#allocation2]   ;;  %s705_s14 = smov [#allocation6]  }
  0x17   :  { %27 = dma.vmem_to_smem %s25_s29, 16, %s704_s0, [#allocation5]  }
  0x18   :  { %s37_s15 = sshll.u32 %s705_s14, 4  ;;  %s38_s15 = int_to_ptr.vmem [resolvable:$true] %s37_s15 }
  0x19   :  { %s643_s16 = scalar_lea.vmem %s38_s15, 16384  ;;  %p648_p11 = scmp.lt.s32.totalorder %s38_s15, %s38_s15 }
  0x1a   :  { %p644_p10 = scmp.ne.s32.totalorder %s38_s15, %s643_s16  ;;  %p649_p12 = scmp.lt.s32.totalorder %s643_s16, %s643_s16 }
  0x1c   :  { %p650_p13 = por %p649_p12, %p648_p11 }
  0x1e   :  { %p651_p0 = pnand %p650_p13, %p644_p10 }
  0x20   :  { %654 = shalt.err (!%p651_p0)
}
  0x21   :  { %s706_s4 = smov 512   ;;  %s707_s17 = smov 32  }
  0x22   :  { %43 = dma.hbm_to_vmem [thread:$0]  %s803_s3, 16384, %s38_s15, [#allocation3], %s706_s4, %s706_s4, %s707_s17  }
  0x23   :  { %s708_s20 = smov [#allocation9]  }
  0x24   :  { %s59_s21 = sshll.u32 %s708_s20, 4  ;;  %s60_s21 = int_to_ptr.vmem [resolvable:$true] %s59_s21 }
  0x25   :  { %s663_s22 = scalar_lea.vmem %s60_s21, 2048  ;;  %p668_p2 = scmp.lt.s32.totalorder %s60_s21, %s60_s21 }
  0x26   :  { %p664_p1 = scmp.ne.s32.totalorder %s60_s21, %s663_s22  ;;  %p669_p3 = scmp.lt.s32.totalorder %s663_s22, %s663_s22 }
  0x28   :  { %p670_p4 = por %p669_p3, %p668_p2 }
  0x2a   :  { %p671_p5 = pnand %p670_p4, %p664_p1 }
  0x2c   :  { %674 = shalt.err (!%p671_p5)
}
  0x2d   :  { %s709_s23 = smov 128   ;;  %s710_s24 = smov 8  }
  0x2e   :  { %65 = dma.hbm_to_vmem [thread:$0]  %s805_s5, 2048, %s60_s21, [#allocation8], %s709_s23, %s709_s23, %s710_s24  }
  0x2f   :  { %695 = dma.done.wait [#allocation5], 16  }
  0x30   :  { %696 = vsyncadd [#allocation5], 4294967280 }
  0x31   :  { %697 = dma.done.wait [#allocation3], 16384  }
  0x32   :  { %698 = vsyncadd [#allocation3], 4294950912 }
  0x33   :  { %699 = dma.done.wait [#allocation8], 2112  }
  0x34   :  { %700 = vsyncadd [#allocation8], 4294965184 }
  0x35   :  { %80 = sfence }
  0x36   :  { %v157_v0 = vld [vmem:[#allocation6 + $0x1e8] sm:$0xff]  ;;  %v156_v1 = vld [vmem:[#allocation6 + $0x1e0] sm:$0xff]  ;;  %v159_v12 = vld [vmem:[#allocation6 + $0x1f8] sm:$0xff]  ;;  %s779_s27 = sld [smem:[#allocation2 + $0x1]]  ;;  %vm93_vm0 = vcmask 1040384   ;;  %vm712_vm1 = vmmov 0  }
  0x37   :  { %v153_v2 = vld [vmem:[#allocation6 + $0x1c8] sm:$0xff]  ;;  %246 = vmatprep.subr.mxu0 %v157_v0  ;;  %v152_v3 = vld [vmem:[#allocation6 + $0x1c0] sm:$0xff]  ;;  %317 = vmatprep.subr.mxu1 %v159_v12  ;;  %v158_v14 = vld [vmem:[#allocation6 + $0x1f0] sm:$0xff]  ;;  %s713_s14 = smov [#allocation10]  }
  0x38   :  { %247 = vmatpush1.msra.mxu0 %v156_v1  ;;  %v149_v4 = vld [vmem:[#allocation6 + $0x1a8] sm:$0xff]  ;;  %v148_v5 = vld [vmem:[#allocation6 + $0x1a0] sm:$0xff]  ;;  %318 = vmatpush1.msra.mxu1 %v158_v14  ;;  %v155_v16 = vld [vmem:[#allocation6 + $0x1d8] sm:$0xff]  ;;  %s508_s15 = sshll.u32 %s713_s14, 4  ;;  %s509_s15 = int_to_ptr.vmem [resolvable:$true] %s508_s15 }
  0x39   :  { %248 = vmatprep.subr.mxu0 %v153_v2  ;;  %v145_v6 = vld [vmem:[#allocation6 + $0x188] sm:$0xff]  ;;  %v144_v7 = vld [vmem:[#allocation6 + $0x180] sm:$0xff]  ;;  %v154_v17 = vld [vmem:[#allocation6 + $0x1d0] sm:$0xff]  ;;  %319 = vmatprep.subr.mxu1 %v155_v16  ;;  %s675_s16 = scalar_lea.vmem %s509_s15, 32  ;;  %p680_p7 = scmp.lt.s32.totalorder %s509_s15, %s509_s15 }
  0x3a   :  { %249 = vmatpush1.msra.mxu0 %v152_v3  ;;  %v141_v8 = vld [vmem:[#allocation6 + $0x168] sm:$0xff]  ;;  %v140_v9 = vld [vmem:[#allocation6 + $0x160] sm:$0xff]  ;;  %v151_v19 = vld [vmem:[#allocation6 + $0x1b8] sm:$0xff]  ;;  %320 = vmatpush1.msra.mxu1 %v154_v17  ;;  %p676_p6 = scmp.ne.s32.totalorder %s509_s15, %s675_s16  ;;  %p681_p8 = scmp.lt.s32.totalorder %s675_s16, %s675_s16 }
  0x3b   :  { %250 = vmatprep.subr.mxu0 %v149_v4  ;;  %v137_v10 = vld [vmem:[#allocation6 + $0x148] sm:$0xff]  ;;  %v136_v11 = vld [vmem:[#allocation6 + $0x140] sm:$0xff]  ;;  %v150_v21 = vld [vmem:[#allocation6 + $0x1b0] sm:$0xff]  ;;  %321 = vmatprep.subr.mxu1 %v151_v19 }
  0x3c   :  { %251 = vmatpush1.msra.mxu0 %v148_v5  ;;  %v133_v13 = vld [vmem:[#allocation6 + $0x128] sm:$0xff]  ;;  %v132_v15 = vld [vmem:[#allocation6 + $0x120] sm:$0xff]  ;;  %v147_v22 = vld [vmem:[#allocation6 + $0x198] sm:$0xff]  ;;  %322 = vmatpush1.msra.mxu1 %v150_v21  ;;  %s85_s11 = scalar_lea.vmem %s801_s1, %s779_s27  ;;  %p682_p9 = por %p681_p8, %p680_p7 }
  0x3d   :  { %252 = vmatprep.subr.mxu0 %v145_v6  ;;  %v129_v18 = vld [vmem:[#allocation6 + $0x108] sm:$0xff]  ;;  %v128_v20 = vld [vmem:[#allocation6 + $0x100] sm:$0xff]  ;;  %v146_v24 = vld [vmem:[#allocation6 + $0x190] sm:$0xff]  ;;  %323 = vmatprep.subr.mxu1 %v147_v22 }
  0x3e   :  { %253 = vmatpush1.msra.mxu0 %v144_v7  ;;  %v125_v23 = vld [vmem:[#allocation6 + $0xe8] sm:$0xff]  ;;  %v124_v25 = vld [vmem:[#allocation6 + $0xe0] sm:$0xff]  ;;  %v143_v26 = vld [vmem:[#allocation6 + $0x178] sm:$0xff]  ;;  %324 = vmatpush1.msra.mxu1 %v146_v24  ;;  %p683_p10 = pnand %p682_p9, %p676_p6 }
  0x3f   :  { %254 = vmatprep.subr.mxu0 %v141_v8  ;;  %v121_v27 = vld [vmem:[#allocation6 + $0xc8] sm:$0xff]  ;;  %v142_v28 = vld [vmem:[#allocation6 + $0x170] sm:$0xff]  ;;  %v120_v29 = vld [vmem:[#allocation6 + $0xc0] sm:$0xff]  ;;  %325 = vmatprep.subr.mxu1 %v143_v26 }
  0x40   :  { %255 = vmatpush1.msra.mxu0 %v140_v9  ;;  %v139_v30 = vld [vmem:[#allocation6 + $0x158] sm:$0xff]  ;;  %v117_v31 = vld [vmem:[#allocation6 + $0xa8] sm:$0xff]  ;;  %v138_v32 = vld [vmem:[#allocation6 + $0x150] sm:$0xff]  ;;  %326 = vmatpush1.msra.mxu1 %v142_v28 }
  0x41   :  { %256 = vmatprep.subr.mxu0 %v137_v10  ;;  %v116_v33 = vld [vmem:[#allocation6 + $0xa0] sm:$0xff]  ;;  %v135_v34 = vld [vmem:[#allocation6 + $0x138] sm:$0xff]  ;;  %v113_v35 = vld [vmem:[#allocation6 + $0x88] sm:$0xff]  ;;  %327 = vmatprep.subr.mxu1 %v139_v30 }
  0x42   :  { %257 = vmatpush1.msra.mxu0 %v136_v11  ;;  %v134_v36 = vld [vmem:[#allocation6 + $0x130] sm:$0xff]  ;;  %v112_v37 = vld [vmem:[#allocation6 + $0x80] sm:$0xff]  ;;  %328 = vmatpush1.msra.mxu1 %v138_v32  ;;  %v131_v38 = vld [vmem:[#allocation6 + $0x118] sm:$0xff] }
  0x43   :  { %258 = vmatprep.subr.mxu0 %v133_v13  ;;  %v109_v39 = vld [vmem:[#allocation6 + $0x68] sm:$0xff]  ;;  %329 = vmatprep.subr.mxu1 %v135_v34  ;;  %v130_v40 = vld [vmem:[#allocation6 + $0x110] sm:$0xff]  ;;  %v108_v41 = vld [vmem:[#allocation6 + $0x60] sm:$0xff] }
  0x44   :  { %259 = vmatpush1.msra.mxu0 %v132_v15  ;;  %330 = vmatpush1.msra.mxu1 %v134_v36  ;;  %v127_v42 = vld [vmem:[#allocation6 + $0xf8] sm:$0xff]  ;;  %v105_v43 = vld [vmem:[#allocation6 + $0x48] sm:$0xff]  ;;  %v126_v44 = vld [vmem:[#allocation6 + $0xf0] sm:$0xff] }
  0x45   :  { %260 = vmatprep.subr.mxu0 %v129_v18  ;;  %331 = vmatprep.subr.mxu1 %v131_v38  ;;  %v104_v45 = vld [vmem:[#allocation6 + $0x40] sm:$0xff]  ;;  %v123_v46 = vld [vmem:[#allocation6 + $0xd8] sm:$0xff]  ;;  %v101_v47 = vld [vmem:[#allocation6 + $0x28] sm:$0xff] }
  0x46   :  { %261 = vmatpush1.msra.mxu0 %v128_v20  ;;  %332 = vmatpush1.msra.mxu1 %v130_v40  ;;  %v122_v48 = vld [vmem:[#allocation6 + $0xd0] sm:$0xff]  ;;  %v100_v49 = vld [vmem:[#allocation6 + $0x20] sm:$0xff]  ;;  %v119_v50 = vld [vmem:[#allocation6 + $0xb8] sm:$0xff] }
  0x47   :  { %262 = vmatprep.subr.mxu0 %v125_v23  ;;  %333 = vmatprep.subr.mxu1 %v127_v42  ;;  %v97_v51 = vld [vmem:[#allocation6 + $0x8] sm:$0xff]  ;;  %v118_v52 = vld [vmem:[#allocation6 + $0xb0] sm:$0xff]  ;;  %v96_v53 = vld [vmem:[#allocation6] sm:$0xff] }
  0x48   :  { %263 = vmatpush1.msra.mxu0 %v124_v25  ;;  %334 = vmatpush1.msra.mxu1 %v126_v44  ;;  %v115_v54 = vld [vmem:[#allocation6 + $0x98] sm:$0xff]  ;;  %v221_v55 = vld [vmem:[#allocation6 + $0x3e8] sm:$0xff]  ;;  %v114_v56 = vld [vmem:[#allocation6 + $0x90] sm:$0xff] }
  0x49   :  { %264 = vmatprep.subr.mxu0 %v121_v27  ;;  %335 = vmatprep.subr.mxu1 %v123_v46  ;;  %v220_v57 = vld [vmem:[#allocation6 + $0x3e0] sm:$0xff]  ;;  %v111_v58 = vld [vmem:[#allocation6 + $0x78] sm:$0xff]  ;;  %v217_v59 = vld [vmem:[#allocation6 + $0x3c8] sm:$0xff] }
  0x4a   :  { %265 = vmatpush1.msra.mxu0 %v120_v29  ;;  %336 = vmatpush1.msra.mxu1 %v122_v48  ;;  %v110_v60 = vld [vmem:[#allocation6 + $0x70] sm:$0xff]  ;;  %v216_v61 = vld [vmem:[#allocation6 + $0x3c0] sm:$0xff]  ;;  %v107_v62 = vld [vmem:[#allocation6 + $0x58] sm:$0xff] }
  0x4b   :  { %266 = vmatprep.subr.mxu0 %v117_v31  ;;  %337 = vmatprep.subr.mxu1 %v119_v50  ;;  %v213_v63 = vld [vmem:[#allocation6 + $0x3a8] sm:$0xff]  ;;  %v106_v0 = vld [vmem:[#allocation6 + $0x50] sm:$0xff]  ;;  %v212_v1 = vld [vmem:[#allocation6 + $0x3a0] sm:$0xff] }
  0x4c   :  { %267 = vmatpush1.msra.mxu0 %v116_v33  ;;  %338 = vmatpush1.msra.mxu1 %v118_v52  ;;  %v103_v2 = vld [vmem:[#allocation6 + $0x38] sm:$0xff]  ;;  %v209_v3 = vld [vmem:[#allocation6 + $0x388] sm:$0xff]  ;;  %v102_v4 = vld [vmem:[#allocation6 + $0x30] sm:$0xff] }
  0x4d   :  { %268 = vmatprep.subr.mxu0 %v113_v35  ;;  %339 = vmatprep.subr.mxu1 %v115_v54  ;;  %v208_v5 = vld [vmem:[#allocation6 + $0x380] sm:$0xff]  ;;  %v99_v6 = vld [vmem:[#allocation6 + $0x18] sm:$0xff]  ;;  %v205_v7 = vld [vmem:[#allocation6 + $0x368] sm:$0xff] }
  0x4e   :  { %269 = vmatpush1.msra.mxu0 %v112_v37  ;;  %340 = vmatpush1.msra.mxu1 %v114_v56  ;;  %v98_v8 = vld [vmem:[#allocation6 + $0x10] sm:$0xff]  ;;  %v204_v9 = vld [vmem:[#allocation6 + $0x360] sm:$0xff]  ;;  %v223_v10 = vld [vmem:[#allocation6 + $0x3f8] sm:$0xff] }
  0x4f   :  { %270 = vmatprep.subr.mxu0 %v109_v39  ;;  %341 = vmatprep.subr.mxu1 %v111_v58  ;;  %v201_v11 = vld [vmem:[#allocation6 + $0x348] sm:$0xff]  ;;  %v222_v12 = vld [vmem:[#allocation6 + $0x3f0] sm:$0xff]  ;;  %v200_v13 = vld [vmem:[#allocation6 + $0x340] sm:$0xff] }
  0x50   :  { %271 = vmatpush1.msra.mxu0 %v108_v41  ;;  %342 = vmatpush1.msra.mxu1 %v110_v60  ;;  %v219_v14 = vld [vmem:[#allocation6 + $0x3d8] sm:$0xff]  ;;  %v197_v15 = vld [vmem:[#allocation6 + $0x328] sm:$0xff]  ;;  %v774_v16 = vld [vmem:[%s802_s2] sm:$0x3]  ;;  %s777_s2 = sld [smem:[#allocation2]] }
  0x51   :  { %272 = vmatprep.subr.mxu0 %v105_v43  ;;  %343 = vmatprep.subr.mxu1 %v107_v62  ;;  %v196_v17 = vld [vmem:[#allocation6 + $0x320] sm:$0xff]  ;;  %v218_v18 = vld [vmem:[#allocation6 + $0x3d0] sm:$0xff]  ;;  %v193_v19 = vld [vmem:[#allocation6 + $0x308] sm:$0xff] }
  0x52   :  { %273 = vmatpush1.msra.mxu0 %v104_v45  ;;  %344 = vmatpush1.msra.mxu1 %v106_v0  ;;  %v215_v20 = vld [vmem:[#allocation6 + $0x3b8] sm:$0xff]  ;;  %v192_v21 = vld [vmem:[#allocation6 + $0x300] sm:$0xff]  ;;  %v214_v22 = vld [vmem:[#allocation6 + $0x3b0] sm:$0xff] }
  0x53   :  { %274 = vmatprep.subr.mxu0 %v101_v47  ;;  %345 = vmatprep.subr.mxu1 %v103_v2  ;;  %v189_v23 = vld [vmem:[#allocation6 + $0x2e8] sm:$0xff]  ;;  %v211_v24 = vld [vmem:[#allocation6 + $0x398] sm:$0xff]  ;;  %v188_v25 = vld [vmem:[#allocation6 + $0x2e0] sm:$0xff] }
  0x54   :  { %275 = vmatpush1.msra.mxu0 %v100_v49  ;;  %346 = vmatpush1.msra.mxu1 %v102_v4  ;;  %v210_v26 = vld [vmem:[#allocation6 + $0x390] sm:$0xff]  ;;  %v185_v27 = vld [vmem:[#allocation6 + $0x2c8] sm:$0xff]  ;;  %v207_v28 = vld [vmem:[#allocation6 + $0x378] sm:$0xff] }
  0x55   :  { %276 = vmatprep.subr.mxu0 %v97_v51  ;;  %347 = vmatprep.subr.mxu1 %v99_v6  ;;  %v184_v29 = vld [vmem:[#allocation6 + $0x2c0] sm:$0xff]  ;;  %v206_v30 = vld [vmem:[#allocation6 + $0x370] sm:$0xff]  ;;  %v181_v31 = vld [vmem:[#allocation6 + $0x2a8] sm:$0xff] }
  0x56   :  { %277 = vmatpush1.msra.mxu0 %v96_v53  ;;  %348 = vmatpush1.msra.mxu1 %v98_v8  ;;  %v203_v32 = vld [vmem:[#allocation6 + $0x358] sm:$0xff]  ;;  %v180_v33 = vld [vmem:[#allocation6 + $0x2a0] sm:$0xff]  ;;  %v202_v34 = vld [vmem:[#allocation6 + $0x350] sm:$0xff]  ;;  %s82_s30 = scalar_lea.vmem %s801_s1, %s777_s2 }
  0x57   :  { %278 = vmatprep.subr.mxu0 %v221_v55  ;;  %349 = vmatprep.subr.mxu1 %v223_v10  ;;  %v177_v35 = vld [vmem:[#allocation6 + $0x288] sm:$0xff]  ;;  %v199_v36 = vld [vmem:[#allocation6 + $0x338] sm:$0xff]  ;;  %v176_v37 = vld [vmem:[#allocation6 + $0x280] sm:$0xff] }
  0x58   :  { %279 = vmatpush2.msra.mxu0 %v220_v57  ;;  %350 = vmatpush2.msra.mxu1 %v222_v12  ;;  %v198_v38 = vld [vmem:[#allocation6 + $0x330] sm:$0xff]  ;;  %v173_v39 = vld [vmem:[#allocation6 + $0x268] sm:$0xff]  ;;  %v195_v40 = vld [vmem:[#allocation6 + $0x318] sm:$0xff] }
  0x59   :  { %280 = vmatprep.subr.mxu0 %v217_v59  ;;  %351 = vmatprep.subr.mxu1 %v219_v14  ;;  %v172_v41 = vld [vmem:[#allocation6 + $0x260] sm:$0xff]  ;;  %v194_v42 = vld [vmem:[#allocation6 + $0x310] sm:$0xff]  ;;  %v169_v43 = vld [vmem:[#allocation6 + $0x248] sm:$0xff] }
  0x5a   :  { %281 = vmatpush2.msra.mxu0 %v216_v61  ;;  %310 = vmatprep.mubr.f32.mxu0 %v774_v16  ;;  %v191_v44 = vld [vmem:[#allocation6 + $0x2f8] sm:$0xff]  ;;  %v168_v45 = vld [vmem:[#allocation6 + $0x240] sm:$0xff]  ;;  %v190_v46 = vld [vmem:[#allocation6 + $0x2f0] sm:$0xff] }
  0x5b   :  { %282 = vmatprep.subr.mxu0 %v213_v63  ;;  %352 = vmatpush2.msra.mxu1 %v218_v18  ;;  %v165_v47 = vld [vmem:[#allocation6 + $0x228] sm:$0xff]  ;;  %v164_v48 = vld [vmem:[#allocation6 + $0x220] sm:$0xff]  ;;  %v187_v49 = vld [vmem:[#allocation6 + $0x2d8] sm:$0xff] }
  0x5c   :  { %283 = vmatpush2.msra.mxu0 %v212_v1  ;;  %353 = vmatprep.subr.mxu1 %v215_v20  ;;  %v83_v50 = vld [vmem:[%s82_s30] sm:$0x1]  ;;  %v186_v52 = vld [vmem:[#allocation6 + $0x2d0] sm:$0xff]  ;;  %v161_v53 = vld [vmem:[#allocation6 + $0x208] sm:$0xff] }
  0x5d   :  { %284 = vmatprep.subr.mxu0 %v209_v3  ;;  %354 = vmatpush2.msra.mxu1 %v214_v22  ;;  %v526_v51 = vld [vmem:[%s85_s11] ss:$0 sm:$0xff]  ;;  %v183_v54 = vld [vmem:[#allocation6 + $0x2b8] sm:$0xff]  ;;  %v182_v56 = vld [vmem:[#allocation6 + $0x2b0] sm:$0xff]  ;;  %v226_v22 = vlaneseq }
  0x5e   :  { %285 = vmatpush2.msra.mxu0 %v208_v5  ;;  %355 = vmatprep.subr.mxu1 %v211_v24  ;;  %v160_v55 = vld [vmem:[#allocation6 + $0x200] sm:$0xff]  ;;  %v94_v57 = vsel %vm93_vm0, %v83_v50, %v526_v51  ;;  %v179_v58 = vld [vmem:[#allocation6 + $0x298] sm:$0xff]  ;;  %v178_v59 = vld [vmem:[#allocation6 + $0x290] sm:$0xff]  ;;  %v711_v5 = vmov 0.0  }
  0x5f   :  { %286 = vmatprep.subr.mxu0 %v205_v7  ;;  %356 = vmatpush2.msra.mxu1 %v210_v26  ;;  %v175_v60 = vld [vmem:[#allocation6 + $0x278] sm:$0xff]  ;;  %v174_v61 = vld [vmem:[#allocation6 + $0x270] sm:$0xff]  ;;  %v420_v8 = vld [vmem:[#allocation9 + $0x60] sm:$0xff] }
  0x60   :  { %287 = vmatpush2.msra.mxu0 %v204_v9  ;;  %357 = vmatprep.subr.mxu1 %v207_v28  ;;  %v171_v62 = vld [vmem:[#allocation6 + $0x258] sm:$0xff]  ;;  %v170_v63 = vld [vmem:[#allocation6 + $0x250] sm:$0xff]  ;;  %v416_v12 = vld [vmem:[#allocation9 + $0x40] sm:$0xff] }
  0x61   :  { %288 = vmatprep.subr.mxu0 %v201_v11  ;;  %358 = vmatpush2.msra.mxu1 %v206_v30  ;;  %v167_v0 = vld [vmem:[#allocation6 + $0x238] sm:$0xff]  ;;  %v166_v1 = vld [vmem:[#allocation6 + $0x230] sm:$0xff] }
  0x62   :  { %289 = vmatpush2.msra.mxu0 %v200_v13  ;;  %359 = vmatprep.subr.mxu1 %v203_v32  ;;  %v163_v2 = vld [vmem:[#allocation6 + $0x218] sm:$0xff]  ;;  %v162_v3 = vld [vmem:[#allocation6 + $0x210] sm:$0xff] }
  0x63   :  { %290 = vmatprep.subr.mxu0 %v197_v15  ;;  %360 = vmatpush2.msra.mxu1 %v202_v34  ;;  %v423_v4 = vld [vmem:[#allocation9 + $0x78] sm:$0xff]  ;;  %v422_v6 = vld [vmem:[#allocation9 + $0x70] sm:$0xff]  ;;  %v421_v7 = vld [vmem:[#allocation9 + $0x68] sm:$0xff] }
  0x64   :  { %291 = vmatpush2.msra.mxu0 %v196_v17  ;;  %361 = vmatprep.subr.mxu1 %v199_v36  ;;  %v419_v9 = vld [vmem:[#allocation9 + $0x58] sm:$0xff]  ;;  %v418_v10 = vld [vmem:[#allocation9 + $0x50] sm:$0xff]  ;;  %v417_v11 = vld [vmem:[#allocation9 + $0x48] sm:$0xff] }
  0x65   :  { %292 = vmatprep.subr.mxu0 %v193_v19  ;;  %362 = vmatpush2.msra.mxu1 %v198_v38  ;;  %v415_v13 = vld [vmem:[#allocation9 + $0x38] sm:$0xff]  ;;  %v414_v14 = vld [vmem:[#allocation9 + $0x30] sm:$0xff]  ;;  %v413_v15 = vld [vmem:[#allocation9 + $0x28] sm:$0xff] }
  0x66   :  { %293 = vmatpush2.msra.mxu0 %v192_v21  ;;  %363 = vmatprep.subr.mxu1 %v195_v40  ;;  %v412_v17 = vld [vmem:[#allocation9 + $0x20] sm:$0xff]  ;;  %v411_v18 = vld [vmem:[#allocation9 + $0x18] sm:$0xff]  ;;  %v410_v19 = vld [vmem:[#allocation9 + $0x10] sm:$0xff] }
  0x67   :  { %294 = vmatprep.subr.mxu0 %v189_v23  ;;  %364 = vmatpush2.msra.mxu1 %v194_v42  ;;  %v409_v20 = vld [vmem:[#allocation9 + $0x8] sm:$0xff]  ;;  %v408_v21 = vld [vmem:[#allocation9] sm:$0xff]  ;;  %v227_v23 = vshrl.u32 %v226_v22, 7 }
  0x68   :  { %295 = vmatpush2.msra.mxu0 %v188_v25  ;;  %365 = vmatprep.subr.mxu1 %v191_v44  ;;  %v224_v25 = vld [vmem:[#allocation7] sm:$0xf] }
  0x69   :  { %296 = vmatprep.subr.mxu0 %v185_v27  ;;  %366 = vmatpush2.msra.mxu1 %v190_v46  ;;  %v228_v24 = vsub.s32 0, %v227_v23  ;;  %v232_v27 = vsub.s32 1, %v227_v23 }
  0x6a   :  { %297 = vmatpush2.msra.mxu0 %v184_v29  ;;  %367 = vmatprep.subr.mxu1 %v187_v49 }
  0x6b   :  { %298 = vmatprep.subr.mxu0 %v181_v31  ;;  %368 = vmatpush2.msra.mxu1 %v186_v52  ;;  %v229_v26 = vrot.slane %v224_v25, %v228_v24  ;;  %v233_v31 = vrot.slane %v224_v25, %v232_v27 }
  0x6c   :  { %299 = vmatpush2.msra.mxu0 %v180_v33  ;;  %369 = vmatprep.subr.mxu1 %v183_v54 }
  0x6d   :  { %300 = vmatprep.subr.mxu0 %v177_v35  ;;  %370 = vmatpush2.msra.mxu1 %v182_v56  ;;  %v529_v56 = vld [vmem:[%s806_s6] ss:$0 sm:$0xff] }
  0x6e   :  { %301 = vmatpush2.msra.mxu0 %v176_v37  ;;  %371 = vmatprep.subr.mxu1 %v179_v58  ;;  %v240_v37 = vsub.s32 3, %v227_v23 }
  0x6f   :  { %302 = vmatprep.subr.mxu0 %v173_v39  ;;  %372 = vmatpush2.msra.mxu1 %v178_v59  ;;  %v236_v39 = vsub.s32 2, %v227_v23 }
  0x70   :  { %303 = vmatpush2.msra.mxu0 %v172_v41  ;;  %381 = vmatprep.mubr.f32.mxu1 %v774_v16  ;;  %v241_v41 = vrot.slane %v224_v25, %v240_v37 }
  0x71   :  { %304 = vmatprep.subr.mxu0 %v169_v43  ;;  %373 = vmatprep.subr.mxu1 %v175_v60  ;;  %v237_v44 = vrot.slane %v224_v25, %v236_v39 }
  0x72   :  { %305 = vmatpush2.msra.mxu0 %v168_v45  ;;  %374 = vmatpush2.msra.mxu1 %v174_v61 }
  0x73   :  { %306 = vmatprep.subr.mxu0 %v165_v47  ;;  %375 = vmatprep.subr.mxu1 %v171_v62 }
  0x74   :  { %307 = vmatpush2.msra.mxu0 %v164_v48  ;;  %376 = vmatpush2.msra.mxu1 %v170_v63 }
  0x75   :  { %308 = vmatprep.subr.mxu0 %v161_v53  ;;  %377 = vmatprep.subr.mxu1 %v167_v0 }
  0x76   :  { %309 = vmatpush2.msra.mxu0 %v160_v55  ;;  %378 = vmatpush2.msra.mxu1 %v166_v1 }
  0x77   :  { %311 = vmatmul.mubr.f32.vlgmr.msra.gmra.mxu0 %v94_v57  ;;  %379 = vmatprep.subr.mxu1 %v163_v2 }
  0x78   :  { %380 = vmatpush2.msra.mxu1 %v162_v3  ;;  %547 = vmatprep.subr.mxu0 %v711_v5 }
  0x79   :  { %382 = vmatmul.mubr.f32.vlgmr.msra.gmra.mxu1 %v94_v57  ;;  %548 = vmatpush3.msra.mxu0 %v423_v4 }
  0x7a   :  { %549 = vmatprep.subr.mxu0 %v711_v5  ;;  %579 = vmatprep.mubr.msk.f32.mxu0 %vm712_vm1, %v711_v5 }
  0x7b   :  { %550 = vmatpush3.msra.mxu0 %v422_v6 }
  0x7c   :  { %551 = vmatprep.subr.mxu0 %v711_v5 }
  0x7d   :  { %552 = vmatpush3.msra.mxu0 %v421_v7 }
  0x7e   :  { %553 = vmatprep.subr.mxu0 %v711_v5 }
  0x7f   :  { %554 = vmatpush3.msra.mxu0 %v420_v8 }
  0x80   :  { %555 = vmatprep.subr.mxu0 %v711_v5 }
  0x81   :  { %556 = vmatpush3.msra.mxu0 %v419_v9 }
  0x82   :  { %557 = vmatprep.subr.mxu0 %v711_v5 }
  0x83   :  { %558 = vmatpush3.msra.mxu0 %v418_v10 }
  0x84   :  { %559 = vmatprep.subr.mxu0 %v711_v5 }
  0x85   :  { %560 = vmatpush3.msra.mxu0 %v417_v11 }
  0x86   :  { %561 = vmatprep.subr.mxu0 %v711_v5 }
  0x87   :  { %562 = vmatpush3.msra.mxu0 %v416_v12 }
  0x88   :  { %563 = vmatprep.subr.mxu0 %v711_v5 }
  0x89   :  { %564 = vmatpush3.msra.mxu0 %v415_v13 }
  0x8a   :  { %565 = vmatprep.subr.mxu0 %v711_v5 }
  0x8b   :  { %566 = vmatpush3.msra.mxu0 %v414_v14 }
  0x8c   :  { %567 = vmatprep.subr.mxu0 %v711_v5 }
  0x8d   :  { %568 = vmatpush3.msra.mxu0 %v413_v15 }
  0x8e   :  { %569 = vmatprep.subr.mxu0 %v711_v5 }
  0x8f   :  { %570 = vmatpush3.msra.mxu0 %v412_v17 }
  0x90   :  { %571 = vmatprep.subr.mxu0 %v711_v5 }
  0x91   :  { %572 = vmatpush3.msra.mxu0 %v411_v18 }
  0x92   :  { %573 = vmatprep.subr.mxu0 %v711_v5 }
  0x93   :  { %574 = vmatpush3.msra.mxu0 %v410_v19 }
  0x94   :  { %575 = vmatprep.subr.mxu0 %v711_v5 }
  0x95   :  { %576 = vmatpush3.msra.mxu0 %v409_v20 }
  0x96   :  { %577 = vmatprep.subr.mxu0 %v711_v5 }
  0x97   :  { %578 = vmatpush3.msra.mxu0 %v408_v21 }
 0x137   :  { %v312_v28 = vpop.f32.mrf.mxu0 }
 0x138   :  { %v313_v29 = vadd.f32 %v312_v28, %v229_v26 }
 0x139   :  { %v314_v32 = vpop.f32.mrf.mxu0  ;;  %v383_v38 = vpop.f32.mrf.mxu1 }
 0x13a   :  { %v527_v30 = vmul.f32 -1.442695, %v313_v29  ;;  %v315_v33 = vadd.f32 %v314_v32, %v233_v31  ;;  %v384_v47 = vadd.f32 %v383_v38, %v237_v44 }
 0x13b   :  { %v385_v42 = vpop.f32.mrf.mxu1 }
 0x13c   :  { %593 = vpow2.f32 %v527_v30  ;;  %v528_v34 = vmul.f32 -1.442695, %v315_v33  ;;  %v386_v45 = vadd.f32 %v385_v42, %v241_v41 }
 0x13e   :  { %595 = vpow2.f32 %v528_v34 }
 0x149   :  { %v594_v35 = vpop.eup %593 }
 0x14a   :  { %v391_v36 = vadd.f32 1.0, %v594_v35 }
 0x14b   :  { %v596_v40 = vpop.eup %595 }
 0x14c   :  { %597 = vrcp.f32 %v391_v36  ;;  %v397_v43 = vadd.f32 1.0, %v596_v40 }
 0x14e   :  { %599 = vrcp.f32 %v397_v43 }
 0x159   :  { %v598_v46 = vpop.eup %597 }
 0x15a   :  { %v400_v48 = vmul.f32 %v598_v46, %v386_v45 }
 0x15b   :  { %v600_v50 = vpop.eup %599 }
 0x15c   :  { %v401_v49 = vadd.f32 %v400_v48, %v384_v47  ;;  %v403_v51 = vsub.f32 1.0, %v600_v50  ;;  %v405_v54 = vmul.f32 %v600_v50, %v774_v16 }
 0x15e   :  { %601 = vtanh.f32 %v401_v49 }
 0x16b   :  { %v602_v52 = vpop.eup %601 }
 0x16c   :  { %v404_v53 = vmul.f32 %v602_v52, %v403_v51 }
 0x16e   :  { %v406_v55 = vadd.f32 %v405_v54, %v404_v53 }
 0x170   :  { %407 = vst [vmem:[%s808_s8] sm:$0x3] %v406_v55  ;;  %580 = vmatmul.mubr.f32.vlgmr.msra.gmra.mxu0 %v406_v55 }
 0x230   :  { %v497_v57 = vpop.f32.mrf.mxu0 }
 0x231   :  { %v498_v58 = vadd.f32 %v529_v56, %v497_v57 }
 0x232   :  { %v581_v59 = vpop.f32.mrf.mxu0 }
 0x233   :  { %501 = vst [vmem:[#allocation10] sm:$0x3] %v498_v58 }
 0x234   :  { %686 = shalt.err (!%p683_p10)
}
 0x235   :  { %511 = dma.vmem_to_hbm [thread:$0]  %s509_s15, 32, %s807_s7, [#allocation4]  }
 0x236   :  { %701 = dma.done.wait [#allocation4], 32  }
 0x237   :  { %702 = vsyncadd [#allocation4], 4294967264 }
 0x238   :  { %519 = vsyncpa [#allocation3], 1 }
 0x239   :  { %520 = vsyncpa [#allocation8], 1 }
 0x23a   :  { %521 = vsyncpa [#allocation4], 1 }
 0x23b   :  { %522 = vsyncpa [#allocation5], 1 }

</bundles_post_ra>
